<compile_context>
chip_gen: v5e
topology: v5e:2x2
jax: 0.10.0
libtpu: 0.0.40
codegen_flags: <defaults>
</compile_context>

<pallas_src>
import jax
import jax.numpy as jnp
from jax.experimental import pallas as pl
from jax.experimental.pallas import tpu as pltpu

_LANE = 128        # TPU lane width; hidden dim (16) is zero-padded to this.
_IN_FEATURES = 4   # CartPole state size.


def _round_up(a, m):
    return (a + m - 1) // m * m


def _mlp_kernel(x_ref, w1_ref, w2_ref, w3_ref, b_ref, o_ref):
    """Fused 3-layer MLP on one batch tile.

    x_ref : (TB, 4)   f32 input tile
    w1_ref: (4, 128)  } MXU operand dtype (bf16 or f32), hidden dims zero-padded
    w2_ref: (128,128) }
    w3_ref: (128, n_actions)
    b_ref : (3, 128)  stacked biases in the elementwise/activation dtype
    o_ref : (TB, n_actions) f32 — only real action columns are written
    """
    w_dtype = w1_ref.dtype      # MXU operand dtype
    a_dtype = b_ref.dtype       # elementwise / activation dtype
    na = o_ref.shape[-1]

    x = x_ref[...].astype(w_dtype)                                        # (TB, 4)
    b = b_ref[...]                                                        # (3, 128)

    h1 = jnp.dot(x, w1_ref[...], preferred_element_type=jnp.float32).astype(a_dtype)
    h1 = jnp.maximum(h1 + b[0:1, :], 0).astype(w_dtype)                   # (TB, 128)

    h2 = jnp.dot(h1, w2_ref[...], preferred_element_type=jnp.float32).astype(a_dtype)
    h2 = jnp.maximum(h2 + b[1:2, :], 0).astype(w_dtype)                   # (TB, 128)

    out = jnp.dot(h2, w3_ref[...], preferred_element_type=jnp.float32)    # (TB, na)
    o_ref[...] = (out + b[2:3, :na].astype(jnp.float32)).astype(o_ref.dtype)


def _prepare_params(params, use_bf16, bf16_act):
    """Pad weights to lane-aligned shapes, stack biases, cast to operand dtypes."""
    w1, w2, w3 = params["w1"], params["w2"], params["w3"]
    b1, b2, b3 = params["b1"], params["b2"], params["b3"]
    n_actions = w3.shape[1]
    assert w1.shape[0] == _IN_FEATURES and w1.shape[1] <= _LANE
    assert w2.shape[1] <= _LANE and n_actions <= _LANE

    w_dtype = jnp.bfloat16 if use_bf16 else jnp.float32
    a_dtype = jnp.bfloat16 if bf16_act else jnp.float32

    w1p = jnp.pad(w1, ((0, 0), (0, _LANE - w1.shape[1]))).astype(w_dtype)        # (4, 128)
    w2p = jnp.pad(w2, ((0, _LANE - w2.shape[0]),
                       (0, _LANE - w2.shape[1]))).astype(w_dtype)                # (128, 128)
    w3p = jnp.pad(w3, ((0, _LANE - w3.shape[0]), (0, 0))).astype(w_dtype)        # (128, na)
    bstk = jnp.stack([
        jnp.pad(b1.reshape(-1), (0, _LANE - b1.size)),
        jnp.pad(b2.reshape(-1), (0, _LANE - b2.size)),
        jnp.pad(b3.reshape(-1), (0, _LANE - b3.size)),
    ]).astype(a_dtype)                                                            # (3, 128)
    return w1p, w2p, w3p, bstk, n_actions


def dqn_cartpole_forward(x, params, *, tile_b=4096, use_bf16=True, bf16_act=None):
    """Pallas forward. x: (B, ...) flattened to (B, 4). Returns (B, n_actions) f32.

    use_bf16: bf16 MXU operands (f32 accumulation). bf16_act: bf16 elementwise /
    intermediate activations (default = use_bf16; set False on v5e, which has no
    bf16 VPU, or when strict f32 numerics are required).
    """
    if bf16_act is None:
        bf16_act = use_bf16
    x = x.reshape(x.shape[0], -1).astype(jnp.float32)
    batch, feat = x.shape
    assert feat == _IN_FEATURES, "DQNCartpole expects 4 flattened state features"

    w1p, w2p, w3p, bstk, n_actions = _prepare_params(params, use_bf16, bf16_act)

    # Tile selection: minimize last-tile padding, and keep >= 2 (even) grid steps
    # so the batch axis shards across both TensorCores on v7x.
    steps = max(pl.cdiv(batch, int(tile_b)), 2 if batch >= 16 else 1)
    if steps > 1 and steps % 2:
        steps += 1
    tb = _round_up(max(pl.cdiv(batch, steps), 8), 8)
    b_pad = _round_up(batch, tb)
    if b_pad != batch:                       # skip host-side pad when not needed
        x = jnp.pad(x, ((0, b_pad - batch), (0, 0)))
    grid = (b_pad // tb,)

    cost = pl.CostEstimate(
        flops=2 * b_pad * (_IN_FEATURES * _LANE + _LANE * _LANE + _LANE * n_actions),
        transcendentals=0,
        bytes_accessed=int(
            x.size * x.dtype.itemsize
            + b_pad * n_actions * 4
            + w1p.size * w1p.dtype.itemsize
            + w2p.size * w2p.dtype.itemsize
            + w3p.size * w3p.dtype.itemsize
            + bstk.size * bstk.dtype.itemsize),
    )

    out = pl.pallas_call(
        _mlp_kernel,
        out_shape=jax.ShapeDtypeStruct((b_pad, n_actions), jnp.float32),
        grid_spec=pltpu.PrefetchScalarGridSpec(
            num_scalar_prefetch=0,
            grid=grid,
            in_specs=[
                pl.BlockSpec((tb, _IN_FEATURES), lambda i: (i, 0)),       # x: batch-tiled
                pl.BlockSpec((_IN_FEATURES, _LANE), lambda i: (0, 0)),    # w1: resident
                pl.BlockSpec((_LANE, _LANE), lambda i: (0, 0)),           # w2: resident
                pl.BlockSpec((_LANE, n_actions), lambda i: (0, 0)),       # w3: resident
                pl.BlockSpec((3, _LANE), lambda i: (0, 0)),               # stacked biases
            ],
            out_specs=pl.BlockSpec((tb, n_actions), lambda i: (i, 0)),    # narrow output
        ),
        compiler_params=pltpu.CompilerParams(
            dimension_semantics=("parallel",)),   # megacore split on v7x
        cost_estimate=cost,
    )(x, w1p, w2p, w3p, bstk)

    if b_pad != batch:                       # row slice only when we padded
        out = out[:batch]
    return out


def _reference(x, p):
    x = x.reshape(x.shape[0], -1)
    h1 = jnp.maximum(x @ p["w1"] + p["b1"], 0.0)
    h2 = jnp.maximum(h1 @ p["w2"] + p["b2"], 0.0)
    return h2 @ p["w3"] + p["b3"]


def dqn_cartpole_apply(x, params, *, min_pallas_batch=128, **kwargs):
    """Dispatch: tiny batches (single env steps) -> plain XLA; replay batches -> Pallas."""
    if x.shape[0] < min_pallas_batch:
        return _reference(x, params)
    return dqn_cartpole_forward(x, params, **kwargs)


# TODO(synk): select_action's epsilon-greedy branch (Python `random`, host-side
# argmax of a single env step) is host control flow, not kernel work — omitted.


def init_params(key, n_actions):
    """Deterministic init mimicking torch.nn.Linear default U(-1/sqrt(fan_in), ...)."""
    def linear(k, fan_in, fan_out):
        kw, kb = jax.random.split(k)
        bound = 1.0 / jnp.sqrt(fan_in)
        w = jax.random.uniform(kw, (fan_in, fan_out), jnp.float32, -bound, bound)
        b = jax.random.uniform(kb, (fan_out,), jnp.float32, -bound, bound)
        return w, b

    k1, k2, k3 = jax.random.split(key, 3)
    w1, b1 = linear(k1, 4, 16)
    w2, b2 = linear(k2, 16, 16)
    w3, b3 = linear(k3, 16, n_actions)
    return {"w1": w1, "b1": b1, "w2": w2, "b2": b2, "w3": w3, "b3": b3}


if __name__ == "__main__":
    key = jax.random.PRNGKey(0)
    k_x, k_p, k_big = jax.random.split(key, 3)

    n_actions = 2  # CartPole: left / right
    params = init_params(k_p, n_actions)

    # 1) CartPole-shaped small batch (B=2, 4 features), strict f32 path.
    x_small = jax.random.normal(k_x, (2, _IN_FEATURES), jnp.float32)
    out_small = jax.block_until_ready(
        dqn_cartpole_forward(x_small, params, use_bf16=False, bf16_act=False))
    ref_small = _reference(x_small, params)
    assert out_small.shape == (2, n_actions)
    assert jnp.allclose(out_small, ref_small, atol=1e-5, rtol=1e-5), "f32 small-batch mismatch"

    # 2) Multi-tile grid with ragged batch (padding + even-step logic exercised), f32.
    x_big = jax.random.normal(k_big, (300, _IN_FEATURES), jnp.float32)
    out_big = jax.block_until_ready(
        dqn_cartpole_forward(x_big, params, tile_b=128, use_bf16=False, bf16_act=False))
    ref_big = _reference(x_big, params)
    assert out_big.shape == (300, n_actions)
    assert jnp.allclose(out_big, ref_big, atol=1e-5, rtol=1e-5), "f32 multi-tile mismatch"

    # 3) Default path: bf16 MXU operands + bf16 activations (f32 accumulation).
    out_bf16 = jax.block_until_ready(dqn_cartpole_forward(x_big, params, tile_b=128))
    assert out_bf16.shape == (300, n_actions)
    assert jnp.allclose(out_bf16, ref_big, atol=5e-2, rtol=5e-2), "bf16 path mismatch"

    # 4) Dispatch wrapper: tiny env-step batch goes through plain XLA.
    out_apply = jax.block_until_ready(dqn_cartpole_apply(x_small, params))
    assert jnp.allclose(out_apply, ref_small, atol=1e-5, rtol=1e-5), "dispatch mismatch"

    print("KERNEL_OK")
</pallas_src>

<mosaic_0001>
module attributes {stable_mosaic.version = 11 : i64} {
  func.func @_mlp_kernel(%arg0: i32, %arg1: memref<8x4xf32, #tpu.memory_space<vmem>>, %arg2: memref<4x128xf32, #tpu.memory_space<vmem>>, %arg3: memref<128x128xf32, #tpu.memory_space<vmem>>, %arg4: memref<128x2xf32, #tpu.memory_space<vmem>>, %arg5: memref<3x128xf32, #tpu.memory_space<vmem>>, %arg6: memref<8x2xf32, #tpu.memory_space<vmem>>) attributes {dimension_semantics = [#tpu.dimension_semantics<parallel>], iteration_bounds = array<i64: 1>, scalar_prefetch = 0 : i64, scratch_operands = 0 : i64, tpu.core_type = #tpu.core_type<tc>, window_params = [{transform_indices = @transform_0, window_bounds = array<i64: 8, 4>}, {pipeline_mode = #tpu.pipeline_mode<synchronous>, transform_indices = @transform_1, window_bounds = array<i64: 4, 128>}, {pipeline_mode = #tpu.pipeline_mode<synchronous>, transform_indices = @transform_2, window_bounds = array<i64: 128, 128>}, {pipeline_mode = #tpu.pipeline_mode<synchronous>, transform_indices = @transform_3, window_bounds = array<i64: 128, 2>}, {pipeline_mode = #tpu.pipeline_mode<synchronous>, transform_indices = @transform_4, window_bounds = array<i64: 3, 128>}, {transform_indices = @transform_5, window_bounds = array<i64: 8, 2>}]} {
    %c0 = arith.constant 0 : index
    %c0_0 = arith.constant 0 : index
    %0 = vector.load %arg1[%c0, %c0_0] : memref<8x4xf32, #tpu.memory_space<vmem>>, vector<8x4xf32>
    %c0_1 = arith.constant 0 : index
    %c0_2 = arith.constant 0 : index
    %1 = vector.load %arg5[%c0_1, %c0_2] : memref<3x128xf32, #tpu.memory_space<vmem>>, vector<3x128xf32>
    %c0_3 = arith.constant 0 : index
    %c0_4 = arith.constant 0 : index
    %2 = vector.load %arg2[%c0_3, %c0_4] : memref<4x128xf32, #tpu.memory_space<vmem>>, vector<4x128xf32>
    %cst = arith.constant dense<0.000000e+00> : vector<8x128xf32>
    %3 = tpu.matmul %0, %2, %cst {dimension_numbers = #tpu.dot_dimension_numbers<[1], [0], [0], [1], [0, 0, 1, 1], [], []>} : vector<8x4xf32>, vector<4x128xf32>, vector<8x128xf32> -> vector<8x128xf32>
    %4 = vector.extract_strided_slice %1 {offsets = [0, 0], sizes = [1, 128], strides = [1, 1]} : vector<3x128xf32> to vector<1x128xf32>
    %5 = vector.broadcast %4 : vector<1x128xf32> to vector<8x128xf32>
    %6 = arith.addf %3, %5 : vector<8x128xf32>
    %cst_5 = arith.constant 0.000000e+00 : f32
    %7 = vector.broadcast %cst_5 : f32 to vector<8x128xf32>
    %8 = arith.maximumf %6, %7 : vector<8x128xf32>
    %c0_6 = arith.constant 0 : index
    %c0_7 = arith.constant 0 : index
    %9 = vector.load %arg3[%c0_6, %c0_7] : memref<128x128xf32, #tpu.memory_space<vmem>>, vector<128x128xf32>
    %cst_8 = arith.constant dense<0.000000e+00> : vector<8x128xf32>
    %10 = tpu.matmul %8, %9, %cst_8 {dimension_numbers = #tpu.dot_dimension_numbers<[1], [0], [0], [1], [0, 0, 1, 1], [], []>} : vector<8x128xf32>, vector<128x128xf32>, vector<8x128xf32> -> vector<8x128xf32>
    %11 = vector.extract_strided_slice %1 {offsets = [1, 0], sizes = [1, 128], strides = [1, 1]} : vector<3x128xf32> to vector<1x128xf32>
    %12 = vector.broadcast %11 : vector<1x128xf32> to vector<8x128xf32>
    %13 = arith.addf %10, %12 : vector<8x128xf32>
    %cst_9 = arith.constant 0.000000e+00 : f32
    %14 = vector.broadcast %cst_9 : f32 to vector<8x128xf32>
    %15 = arith.maximumf %13, %14 : vector<8x128xf32>
    %c0_10 = arith.constant 0 : index
    %c0_11 = arith.constant 0 : index
    %16 = vector.load %arg4[%c0_10, %c0_11] : memref<128x2xf32, #tpu.memory_space<vmem>>, vector<128x2xf32>
    %cst_12 = arith.constant dense<0.000000e+00> : vector<8x2xf32>
    %17 = tpu.matmul %15, %16, %cst_12 {dimension_numbers = #tpu.dot_dimension_numbers<[1], [0], [0], [1], [0, 0, 1, 1], [], []>} : vector<8x128xf32>, vector<128x2xf32>, vector<8x2xf32> -> vector<8x2xf32>
    %18 = vector.extract_strided_slice %1 {offsets = [2, 0], sizes = [1, 2], strides = [1, 1]} : vector<3x128xf32> to vector<1x2xf32>
    %19 = vector.broadcast %18 : vector<1x2xf32> to vector<8x2xf32>
    %20 = arith.addf %17, %19 : vector<8x2xf32>
    %c0_13 = arith.constant 0 : index
    %c0_14 = arith.constant 0 : index
    %21 = vector.load %arg6[%c0_13, %c0_14] : memref<8x2xf32, #tpu.memory_space<vmem>>, vector<8x2xf32>
    tpu.vector_store %arg6[%c0_13, %c0_14], %20 {strides = array<i32>} : memref<8x2xf32, #tpu.memory_space<vmem>>, vector<8x2xf32>,
    return
  }
  func.func @transform_0(%arg0: i32) -> (i32, i32) {
    %c0_i32 = arith.constant 0 : i32
    %c0_i32_0 = arith.constant 0 : i32
    return %arg0, %c0_i32 : i32, i32
  }
  func.func @transform_1(%arg0: i32) -> (i32, i32) {
    %c0_i32 = arith.constant 0 : i32
    %c0_i32_0 = arith.constant 0 : i32
    %c0_i32_1 = arith.constant 0 : i32
    return %c0_i32, %c0_i32_0 : i32, i32
  }
  func.func @transform_2(%arg0: i32) -> (i32, i32) {
    %c0_i32 = arith.constant 0 : i32
    %c0_i32_0 = arith.constant 0 : i32
    %c0_i32_1 = arith.constant 0 : i32
    return %c0_i32, %c0_i32_0 : i32, i32
  }
  func.func @transform_3(%arg0: i32) -> (i32, i32) {
    %c0_i32 = arith.constant 0 : i32
    %c0_i32_0 = arith.constant 0 : i32
    %c0_i32_1 = arith.constant 0 : i32
    return %c0_i32, %c0_i32_0 : i32, i32
  }
  func.func @transform_4(%arg0: i32) -> (i32, i32) {
    %c0_i32 = arith.constant 0 : i32
    %c0_i32_0 = arith.constant 0 : i32
    %c0_i32_1 = arith.constant 0 : i32
    return %c0_i32, %c0_i32_0 : i32, i32
  }
  func.func @transform_5(%arg0: i32) -> (i32, i32) {
    %c0_i32 = arith.constant 0 : i32
    %c0_i32_0 = arith.constant 0 : i32
    return %arg0, %c0_i32 : i32, i32
  }
}

</mosaic_0001>

<bundles_post_ra>
// kernel: tpu_custom_call.1
= control target key start
LH: loop header
LB: loop body
LE: loop exit
PB: predicated region body
PF: predicated region fallthrough
CT: control target
= control target key end

     0   :  { %vm28_vm0 = vcmask 1043456   ;;  %vm24_vm1 = vcmask 31744   ;;  %vm128_vm2 = vcmask 15360   ;;  %s274_s1 = inlined_call_operand.vmem [shape: f32[4,128], index: 1, kind: input, shape index: {}]   ;;  %s275_s0 = inlined_call_operand.vmem [shape: f32[8,4], index: 0, kind: input, shape index: {}]   ;;  %s276_s2 = inlined_call_operand.vmem [shape: f32[128,128], index: 2, kind: input, shape index: {}]   ;;  %s277_s3 = inlined_call_operand.vmem [shape: f32[128,2], index: 3, kind: input, shape index: {}]   ;;  %s278_s4 = inlined_call_operand.vmem [shape: f32[3,128], index: 4, kind: input, shape index: {}]   ;;  %s279_s5 = inlined_call_operand.vmem [shape: f32[8,2], index: 5, kind: output, shape index: {}]  }
   0x1   :  { %v22_v0 = vld [vmem:[%s274_s1] sm:$0xf]  ;;  %v68_v2 = vld [vmem:[%s276_s2 + $0x78] sm:$0xff]  ;;  %v67_v3 = vld [vmem:[%s276_s2 + $0x70] sm:$0xff] }
   0x2   :  { %v20_v1 = vld [vmem:[%s275_s0] sm:$0xff]  ;;  %134 = vmatpush.msk.msra.mxu0 %vm28_vm0, %v22_v0  ;;  %70 = vmatpush.msra.mxu1 %v68_v2  ;;  %v66_v4 = vld [vmem:[%s276_s2 + $0x68] sm:$0xff]  ;;  %v64_v6 = vld [vmem:[%s276_s2 + $0x58] sm:$0xff] }
   0x3   :  { %135 = vmatmul.msk.f32.vlgmr.msra.gmra.mxu0 %vm24_vm1, %v20_v1  ;;  %v65_v5 = vld [vmem:[%s276_s2 + $0x60] sm:$0xff]  ;;  %v63_v7 = vld [vmem:[%s276_s2 + $0x50] sm:$0xff]  ;;  %v62_v8 = vld [vmem:[%s276_s2 + $0x48] sm:$0xff] }
   0x4   :  { %71 = vmatpush.msra.mxu1 %v67_v3  ;;  %v61_v9 = vld [vmem:[%s276_s2 + $0x40] sm:$0xff]  ;;  %v60_v10 = vld [vmem:[%s276_s2 + $0x38] sm:$0xff]  ;;  %v59_v11 = vld [vmem:[%s276_s2 + $0x30] sm:$0xff] }
   0x5   :  { %v58_v12 = vld [vmem:[%s276_s2 + $0x28] sm:$0xff]  ;;  %v57_v13 = vld [vmem:[%s276_s2 + $0x20] sm:$0xff]  ;;  %v56_v14 = vld [vmem:[%s276_s2 + $0x18] sm:$0xff] }
   0x6   :  { %72 = vmatpush.msra.mxu1 %v66_v4  ;;  %v55_v15 = vld [vmem:[%s276_s2 + $0x10] sm:$0xff]  ;;  %v54_v16 = vld [vmem:[%s276_s2 + $0x8] sm:$0xff]  ;;  %v53_v17 = vld [vmem:[%s276_s2] sm:$0xff] }
   0x7   :  { %v106_v18 = vld [vmem:[%s277_s3 + $0x78] sm:$0xff]  ;;  %v105_v19 = vld [vmem:[%s277_s3 + $0x70] sm:$0xff]  ;;  %v104_v20 = vld [vmem:[%s277_s3 + $0x68] sm:$0xff] }
   0x8   :  { %73 = vmatpush.msra.mxu1 %v65_v5  ;;  %108 = vmatpush.msra.mxu2 %v106_v18  ;;  %v103_v21 = vld [vmem:[%s277_s3 + $0x60] sm:$0xff]  ;;  %v102_v22 = vld [vmem:[%s277_s3 + $0x58] sm:$0xff]  ;;  %v101_v23 = vld [vmem:[%s277_s3 + $0x50] sm:$0xff] }
   0x9   :  { %v100_v24 = vld [vmem:[%s277_s3 + $0x48] sm:$0xff]  ;;  %v99_v25 = vld [vmem:[%s277_s3 + $0x40] sm:$0xff]  ;;  %v98_v26 = vld [vmem:[%s277_s3 + $0x38] sm:$0xff] }
   0xa   :  { %74 = vmatpush.msra.mxu1 %v64_v6  ;;  %109 = vmatpush.msra.mxu2 %v105_v19  ;;  %v97_v27 = vld [vmem:[%s277_s3 + $0x30] sm:$0xff]  ;;  %v96_v28 = vld [vmem:[%s277_s3 + $0x28] sm:$0xff]  ;;  %v95_v29 = vld [vmem:[%s277_s3 + $0x20] sm:$0xff] }
   0xb   :  { %v21_v30 = vld [vmem:[%s278_s4] sm:$0x7]  ;;  %v94_v31 = vld [vmem:[%s277_s3 + $0x18] sm:$0xff]  ;;  %v93_v36 = vld [vmem:[%s277_s3 + $0x10] sm:$0xff] }
   0xc   :  { %75 = vmatpush.msra.mxu1 %v63_v7  ;;  %110 = vmatpush.msra.mxu2 %v104_v20  ;;  %v23_v32 = vperm.slane %v21_v30, 0  ;;  %v92_v37 = vld [vmem:[%s277_s3 + $0x8] sm:$0xff]  ;;  %v91_v38 = vld [vmem:[%s277_s3] sm:$0xff]  ;;  %v69_v39 = vperm.slane %v21_v30, 1  ;;  %v107_v43 = vperm.slane %v21_v30, 2 }
   0xe   :  { %76 = vmatpush.msra.mxu1 %v62_v8  ;;  %111 = vmatpush.msra.mxu2 %v103_v21 }
  0x10   :  { %77 = vmatpush.msra.mxu1 %v61_v9  ;;  %112 = vmatpush.msra.mxu2 %v102_v22 }
  0x12   :  { %78 = vmatpush.msra.mxu1 %v60_v10  ;;  %113 = vmatpush.msra.mxu2 %v101_v23 }
  0x14   :  { %79 = vmatpush.msra.mxu1 %v59_v11  ;;  %114 = vmatpush.msra.mxu2 %v100_v24 }
  0x16   :  { %80 = vmatpush.msra.mxu1 %v58_v12  ;;  %115 = vmatpush.msra.mxu2 %v99_v25 }
  0x18   :  { %81 = vmatpush.msra.mxu1 %v57_v13  ;;  %116 = vmatpush.msra.mxu2 %v98_v26 }
  0x1a   :  { %82 = vmatpush.msra.mxu1 %v56_v14  ;;  %117 = vmatpush.msra.mxu2 %v97_v27 }
  0x1c   :  { %83 = vmatpush.msra.mxu1 %v55_v15  ;;  %118 = vmatpush.msra.mxu2 %v96_v28 }
  0x1e   :  { %84 = vmatpush.msra.mxu1 %v54_v16  ;;  %119 = vmatpush.msra.mxu2 %v95_v29 }
  0x20   :  { %85 = vmatpush.msra.mxu1 %v53_v17  ;;  %120 = vmatpush.msra.mxu2 %v94_v31 }
  0x22   :  { %121 = vmatpush.msra.mxu2 %v93_v36 }
  0x24   :  { %122 = vmatpush.msra.mxu2 %v92_v37 }
  0x26   :  { %123 = vmatpush.msra.mxu2 %v91_v38 }
  0x80   :  { %v49_v33 = vpop.f32.mrf.mxu0 }
  0x81   :  { %v50_v34 = vadd.f32 %v49_v33, %v23_v32 }
  0x83   :  { %v52_v35 = vmax.f32 %v50_v34, 0.0 }
  0x85   :  { %86 = vmatmul.f32.vlgmr.msra.gmra.mxu1 %v52_v35 }
 0x102   :  { %v87_v40 = vpop.f32.mrf.mxu1 }
 0x103   :  { %v88_v41 = vadd.f32 %v87_v40, %v69_v39 }
 0x105   :  { %v90_v42 = vmax.f32 %v88_v41, 0.0 }
 0x107   :  { %124 = vmatmul.f32.vlgmr.msra.gmra.mxu2 %v90_v42 }
 0x18a   :  { %v125_v44 = vpop.f32.mrf.mxu2 }
 0x18b   :  { %v126_v45 = vadd.f32 %v125_v44, %v107_v43 }
 0x18d   :  { %129 = vst.msk [vmem:[%s279_s5] sm:$0xff] %vm128_vm2, %v126_v45 }

</bundles_post_ra>
